<compile_context>
chip_gen: v6e
topology: v6e:2x2x1
jax: 0.10.0
libtpu: 0.0.40
codegen_flags: <defaults>
</compile_context>

<pallas_src>
import functools

import jax
import jax.numpy as jnp
from jax.experimental import pallas as pl
from jax.experimental.pallas import tpu as pltpu


def _round_up(x, m):
    return (x + m - 1) // m * m


def _cdiv(a, b):
    return (a + b - 1) // b


def _self_output_kernel(x_ref, w_ref, b_ref, o_ref, *, compute_dtype):
    # x_ref: (TM, H) streamed row tile; w_ref: (H, H) VMEM-resident weight;
    # b_ref: (1, H) f32 bias (pre-cast once in the wrapper); o_ref: (TM, H).
    x = x_ref[...]
    if compute_dtype is not None and x.dtype != compute_dtype:
        # In-VMEM cast is free VPU filler under the MXU and avoids a separate
        # wrapper-side (M, H) cast pass over HBM.
        x = x.astype(compute_dtype)
    acc = jnp.dot(x, w_ref[...], preferred_element_type=jnp.float32)
    acc = acc + b_ref[...]  # bias already f32; broadcasts over rows
    # TODO(synk): training-mode dropout (hidden_dropout_prob) would use
    # pltpu.prng_seed + pltpu.stateful_bernoulli; eval mode is identity.
    o_ref[...] = acc.astype(o_ref.dtype)


def deit_self_output(hidden_states, input_tensor, weight, bias,
                     *, tm=512, compute_dtype=None):
    """DeiTSelfOutput forward: dropout(dense(hidden_states)), eval mode.

    hidden_states: (B, S, H).
    input_tensor:  (B, S, H) -- accepted but unused (residual add is in DeiTLayer).
    weight:        (H, H) in (in, out) layout (transpose of nn.Linear's (out, in)
                   storage), so the kernel computes x @ weight + bias == x @ W.T + b.
                   NOTE: square matrix => no shape error if passed untransposed;
                   callers must respect this layout.
    bias:          (H,).
    compute_dtype: optional MXU input dtype (e.g. jnp.bfloat16). Activations are
                   cast in-kernel; accumulation is always f32; output keeps
                   hidden_states.dtype. Recommended on v5e (avoids multi-pass
                   f32 MXU).
    """
    del input_tensor
    B, S, H = hidden_states.shape
    out_dtype = hidden_states.dtype
    M = B * S

    # No padding/slicing of activations: Pallas masks the ragged last row tile.
    x2d = hidden_states.reshape(M, H)
    if compute_dtype is not None and weight.dtype != compute_dtype:
        weight = weight.astype(compute_dtype)          # one-time (H, H) cast
    b2d = bias.astype(jnp.float32).reshape(1, H)       # hoisted single f32 cast

    # Row tile: normalize caller tm (multiple of 16 covers f32 sublane=8 and
    # bf16 packing), never hugely overshoot a tiny M, and make sure the
    # "parallel" axis has >= 2 steps when there is enough work (v7x megacore).
    tm = max(16, _round_up(int(tm), 16))
    TM = min(tm, _round_up(M, 16))
    if M > 256 and _cdiv(M, TM) < 2:
        TM = max(256, _round_up(_cdiv(M, 2), 256))
    grid = (_cdiv(M, TM),)

    x_bytes = x2d.dtype.itemsize
    w_bytes = weight.dtype.itemsize
    o_bytes = jnp.dtype(out_dtype).itemsize

    cost = pl.CostEstimate(
        flops=2 * M * H * H,
        transcendentals=0,
        bytes_accessed=M * H * (x_bytes + o_bytes) + H * H * w_bytes + H * 4,
    )

    kernel = functools.partial(_self_output_kernel, compute_dtype=compute_dtype)

    def build(single_buffer_resident):
        resident_kwargs = (
            dict(pipeline_mode=pl.Buffered(1)) if single_buffer_resident else {}
        )
        w_bufs = 1 if single_buffer_resident else 2
        # VMEM: double-buffered streamed x/out tiles + resident weight/bias.
        vmem_bytes = (2 * TM * H * x_bytes
                      + 2 * TM * H * o_bytes
                      + w_bufs * (H * H * w_bytes + H * 4))
        # Modest headroom; keep well under v7x's 64 MiB physical VMEM.
        vmem_limit = min(max(int(vmem_bytes * 1.25) + (1 << 20), 16 << 20),
                         48 << 20)
        return pl.pallas_call(
            kernel,
            out_shape=jax.ShapeDtypeStruct((M, H), out_dtype),
            grid_spec=pl.GridSpec(
                grid=grid,
                in_specs=[
                    pl.BlockSpec((TM, H), lambda i: (i, 0)),  # streamed rows
                    pl.BlockSpec((H, H), lambda i: (0, 0), **resident_kwargs),
                    pl.BlockSpec((1, H), lambda i: (0, 0), **resident_kwargs),
                ],
                out_specs=pl.BlockSpec((TM, H), lambda i: (i, 0)),
            ),
            compiler_params=pltpu.CompilerParams(
                dimension_semantics=("parallel",),  # row tiles are independent
                vmem_limit_bytes=vmem_limit,
            ),
            cost_estimate=cost,
        )

    try:
        out2d = build(True)(x2d, weight, b2d)
    except Exception:
        # Fallback if this Pallas build rejects pipeline_mode on a pallas_call
        # BlockSpec; double-buffering the resident weight only costs ~H*H bytes
        # of extra VMEM.
        out2d = build(False)(x2d, weight, b2d)

    return out2d.reshape(B, S, H)


if __name__ == "__main__":
    key = jax.random.PRNGKey(0)
    k_x, k_res, k_w, k_b = jax.random.split(key, 4)

    # Small DeiT-like config: batch=2, seq=8, hidden=32.
    B, S, H = 2, 8, 32
    hidden_states = jax.random.normal(k_x, (B, S, H), dtype=jnp.float32)
    input_tensor = jax.random.normal(k_res, (B, S, H), dtype=jnp.float32)

    # nn.Linear stores weight (out, in); the kernel consumes the transpose (in, out).
    w_torch_layout = jax.random.normal(k_w, (H, H), dtype=jnp.float32) * 0.02
    bias = jax.random.normal(k_b, (H,), dtype=jnp.float32) * 0.02
    weight_in_out = w_torch_layout.T  # (in, out)

    ref = (hidden_states.reshape(-1, H) @ weight_in_out + bias).reshape(B, S, H)

    # f32 path (tight tolerance).
    out = jax.block_until_ready(
        deit_self_output(hidden_states, input_tensor, weight_in_out, bias))
    assert jnp.allclose(out, ref, atol=1e-5, rtol=1e-5), "f32 path mismatch vs reference"

    # bf16 MXU-input path with f32 accumulation (relaxed tolerance).
    out_bf16 = jax.block_until_ready(
        deit_self_output(hidden_states, input_tensor, weight_in_out, bias,
                         compute_dtype=jnp.bfloat16))
    assert jnp.allclose(out_bf16, ref, atol=2e-2, rtol=2e-2), "bf16 path mismatch vs reference"

    # Ragged-M path (seq=9 -> M=18): exercises the masked edge row tile that
    # replaces the old wrapper-side pad + slice.
    S2 = 9
    hs2 = jax.random.normal(k_x, (B, S2, H), dtype=jnp.float32)
    ref2 = (hs2.reshape(-1, H) @ weight_in_out + bias).reshape(B, S2, H)
    out2 = jax.block_until_ready(
        deit_self_output(hs2, jnp.zeros_like(hs2), weight_in_out, bias))
    assert jnp.allclose(out2, ref2, atol=1e-5, rtol=1e-5), "ragged-M path mismatch vs reference"

    print("KERNEL_OK")
</pallas_src>

<mosaic_0001>
module attributes {stable_mosaic.version = 11 : i64} {
  func.func @_self_output_kernel(%arg0: i32, %arg1: memref<16x32xf32, #tpu.memory_space<vmem>>, %arg2: memref<32x32xf32, #tpu.memory_space<vmem>>, %arg3: memref<1x32xf32, #tpu.memory_space<vmem>>, %arg4: memref<16x32xf32, #tpu.memory_space<vmem>>) attributes {dimension_semantics = [#tpu.dimension_semantics<parallel>], iteration_bounds = array<i64: 1>, scalar_prefetch = 0 : i64, scratch_operands = 0 : i64, tpu.core_type = #tpu.core_type<tc>, window_params = [{transform_indices = @transform_0, window_bounds = array<i64: 16, 32>}, {pipeline_mode = #tpu.pipeline_mode<synchronous>, transform_indices = @transform_1, window_bounds = array<i64: 32, 32>}, {pipeline_mode = #tpu.pipeline_mode<synchronous>, transform_indices = @transform_2, window_bounds = array<i64: 1, 32>}, {transform_indices = @transform_3, window_bounds = array<i64: 16, 32>}]} {
    %c0 = arith.constant 0 : index
    %c0_0 = arith.constant 0 : index
    %0 = vector.load %arg1[%c0, %c0_0] : memref<16x32xf32, #tpu.memory_space<vmem>>, vector<16x32xf32>
    %c0_1 = arith.constant 0 : index
    %c0_2 = arith.constant 0 : index
    %1 = vector.load %arg2[%c0_1, %c0_2] : memref<32x32xf32, #tpu.memory_space<vmem>>, vector<32x32xf32>
    %cst = arith.constant dense<0.000000e+00> : vector<16x32xf32>
    %2 = tpu.matmul %0, %1, %cst {dimension_numbers = #tpu.dot_dimension_numbers<[1], [0], [0], [1], [0, 0, 1, 1], [], []>} : vector<16x32xf32>, vector<32x32xf32>, vector<16x32xf32> -> vector<16x32xf32>
    %c0_3 = arith.constant 0 : index
    %c0_4 = arith.constant 0 : index
    %3 = vector.load %arg3[%c0_3, %c0_4] : memref<1x32xf32, #tpu.memory_space<vmem>>, vector<1x32xf32>
    %4 = vector.broadcast %3 : vector<1x32xf32> to vector<16x32xf32>
    %5 = arith.addf %2, %4 : vector<16x32xf32>
    %c0_5 = arith.constant 0 : index
    %c0_6 = arith.constant 0 : index
    %6 = vector.load %arg4[%c0_5, %c0_6] : memref<16x32xf32, #tpu.memory_space<vmem>>, vector<16x32xf32>
    tpu.vector_store %arg4[%c0_5, %c0_6], %5 {strides = array<i32>} : memref<16x32xf32, #tpu.memory_space<vmem>>, vector<16x32xf32>,
    return
  }
  func.func @transform_0(%arg0: i32) -> (i32, i32) {
    %c0_i32 = arith.constant 0 : i32
    %c0_i32_0 = arith.constant 0 : i32
    return %arg0, %c0_i32 : i32, i32
  }
  func.func @transform_1(%arg0: i32) -> (i32, i32) {
    %c0_i32 = arith.constant 0 : i32
    %c0_i32_0 = arith.constant 0 : i32
    %c0_i32_1 = arith.constant 0 : i32
    return %c0_i32, %c0_i32_0 : i32, i32
  }
  func.func @transform_2(%arg0: i32) -> (i32, i32) {
    %c0_i32 = arith.constant 0 : i32
    %c0_i32_0 = arith.constant 0 : i32
    %c0_i32_1 = arith.constant 0 : i32
    return %c0_i32, %c0_i32_0 : i32, i32
  }
  func.func @transform_3(%arg0: i32) -> (i32, i32) {
    %c0_i32 = arith.constant 0 : i32
    %c0_i32_0 = arith.constant 0 : i32
    return %arg0, %c0_i32 : i32, i32
  }
}

module attributes {stable_mosaic.version = 11 : i64} {
  func.func @_self_output_kernel(%arg0: i32, %arg1: memref<16x32xf32, #tpu.memory_space<vmem>>, %arg2: memref<32x32xf32, #tpu.memory_space<vmem>>, %arg3: memref<1x32xf32, #tpu.memory_space<vmem>>, %arg4: memref<16x32xf32, #tpu.memory_space<vmem>>) attributes {dimension_semantics = [#tpu.dimension_semantics<parallel>], iteration_bounds = array<i64: 1>, scalar_prefetch = 0 : i64, scratch_operands = 0 : i64, tpu.core_type = #tpu.core_type<tc>, window_params = [{transform_indices = @transform_0, window_bounds = array<i64: 16, 32>}, {pipeline_mode = #tpu.pipeline_mode<synchronous>, transform_indices = @transform_1, window_bounds = array<i64: 32, 32>}, {pipeline_mode = #tpu.pipeline_mode<synchronous>, transform_indices = @transform_2, window_bounds = array<i64: 1, 32>}, {transform_indices = @transform_3, window_bounds = array<i64: 16, 32>}]} {
    %c0 = arith.constant 0 : index
    %c0_0 = arith.constant 0 : index
    %0 = vector.load %arg1[%c0, %c0_0] : memref<16x32xf32, #tpu.memory_space<vmem>>, vector<16x32xf32>
    %c0_1 = arith.constant 0 : index
    %c0_2 = arith.constant 0 : index
    %1 = vector.load %arg2[%c0_1, %c0_2] : memref<32x32xf32, #tpu.memory_space<vmem>>, vector<32x32xf32>
    %cst = arith.constant dense<0.000000e+00> : vector<16x32xf32>
    %2 = tpu.matmul %0, %1, %cst {dimension_numbers = #tpu.dot_dimension_numbers<[1], [0], [0], [1], [0, 0, 1, 1], [], []>} : vector<16x32xf32>, vector<32x32xf32>, vector<16x32xf32> -> vector<16x32xf32>
    %c0_3 = arith.constant 0 : index
    %c0_4 = arith.constant 0 : index
    %3 = vector.load %arg3[%c0_3, %c0_4] : memref<1x32xf32, #tpu.memory_space<vmem>>, vector<1x32xf32>
    %4 = vector.broadcast %3 : vector<1x32xf32> to vector<16x32xf32>
    %5 = arith.addf %2, %4 : vector<16x32xf32>
    %c0_5 = arith.constant 0 : index
    %c0_6 = arith.constant 0 : index
    %6 = vector.load %arg4[%c0_5, %c0_6] : memref<16x32xf32, #tpu.memory_space<vmem>>, vector<16x32xf32>
    tpu.vector_store %arg4[%c0_5, %c0_6], %5 {strides = array<i32>} : memref<16x32xf32, #tpu.memory_space<vmem>>, vector<16x32xf32>,
    return
  }
  func.func @transform_0(%arg0: i32) -> (i32, i32) {
    %c0_i32 = arith.constant 0 : i32
    %c0_i32_0 = arith.constant 0 : i32
    return %arg0, %c0_i32 : i32, i32
  }
  func.func @transform_1(%arg0: i32) -> (i32, i32) {
    %c0_i32 = arith.constant 0 : i32
    %c0_i32_0 = arith.constant 0 : i32
    %c0_i32_1 = arith.constant 0 : i32
    return %c0_i32, %c0_i32_0 : i32, i32
  }
  func.func @transform_2(%arg0: i32) -> (i32, i32) {
    %c0_i32 = arith.constant 0 : i32
    %c0_i32_0 = arith.constant 0 : i32
    %c0_i32_1 = arith.constant 0 : i32
    return %c0_i32, %c0_i32_0 : i32, i32
  }
  func.func @transform_3(%arg0: i32) -> (i32, i32) {
    %c0_i32 = arith.constant 0 : i32
    %c0_i32_0 = arith.constant 0 : i32
    return %arg0, %c0_i32 : i32, i32
  }
}

</mosaic_0001>

<bundles_post_ra>
// kernel: tpu_custom_call.1
= control target key start
LH: loop header
LB: loop body
LE: loop exit
PB: predicated region body
PF: predicated region fallthrough
CT: control target
= control target key end

     0   :  { %8 = vsyncpa [#allocation3], 0  ;;  %s299_s0 = inlined_call_operand.hbm [shape: f32[16,32], index: 0, kind: input, shape index: {}]   ;;  %s300_s1 = inlined_call_operand.hbm [shape: f32[32,32], index: 1, kind: input, shape index: {}]   ;;  %s301_s2 = inlined_call_operand.vmem [shape: f32[1,32], index: 2, kind: input, shape index: {}]   ;;  %s302_s3 = inlined_call_operand.hbm [shape: f32[16,32], index: 3, kind: output, shape index: {}]  }
   0x1   :  { %9 = vsyncpa [#allocation6], 0 }
   0x2   :  { %10 = vsyncpa [#allocation4], 0  ;;  %s249_s12 = smov [#allocation2]  }
   0x3   :  { %s16_s13 = sshll.u32 %s249_s12, 4  ;;  %s17_s13 = int_to_ptr.vmem [resolvable:$true] %s16_s13 }
   0x4   :  { %s191_s14 = scalar_lea.vmem %s17_s13, 256  ;;  %p196_p1 = scmp.lt.s32.totalorder %s17_s13, %s17_s13 }
   0x5   :  { %p192_p0 = scmp.ne.s32.totalorder %s17_s13, %s191_s14  ;;  %p197_p2 = scmp.lt.s32.totalorder %s191_s14, %s191_s14 }
   0x7   :  { %p198_p3 = por %p197_p2, %p196_p1 }
   0x9   :  { %p199_p4 = pnand %p198_p3, %p192_p0 }
   0xb   :  { %202 = shalt.err (!%p199_p4)
}
   0xc   :  { %s250_s15 = smov 128   ;;  %s251_s16 = smov 8  }
   0xd   :  { %22 = dma.hbm_to_vmem [thread:$0]  %s299_s0, 256, %s17_s13, [#allocation3], %s250_s15, %s250_s15, %s251_s16  }
   0xe   :  { %s252_s19 = smov [#allocation5]  }
   0xf   :  { %s28_s20 = sshll.u32 %s252_s19, 4  ;;  %s29_s20 = int_to_ptr.vmem [resolvable:$true] %s28_s20 }
  0x10   :  { %s211_s21 = scalar_lea.vmem %s29_s20, 512  ;;  %p216_p6 = scmp.lt.s32.totalorder %s29_s20, %s29_s20 }
  0x11   :  { %p212_p5 = scmp.ne.s32.totalorder %s29_s20, %s211_s21  ;;  %p217_p7 = scmp.lt.s32.totalorder %s211_s21, %s211_s21 }
  0x13   :  { %p218_p8 = por %p217_p7, %p216_p6 }
  0x15   :  { %p219_p9 = pnand %p218_p8, %p212_p5 }
  0x17   :  { %222 = shalt.err (!%p219_p9)
}
  0x18   :  { %34 = dma.hbm_to_vmem [thread:$0]  %s300_s1, 512, %s29_s20, [#allocation6], %s250_s15, %s250_s15, %s251_s16  }
  0x19   :  { %243 = dma.done.wait [#allocation3], 256  }
  0x1a   :  { %244 = vsyncadd [#allocation3], 4294967040 }
  0x1b   :  { %245 = dma.done.wait [#allocation6], 512  }
  0x1c   :  { %246 = vsyncadd [#allocation6], 4294966784  ;;  %vm56_vm0 = vcmask 261120   ;;  %v48_v0 = vld [vmem:[#allocation5 + $0x18] sm:$0xff]  ;;  %v47_v1 = vld [vmem:[#allocation5 + $0x10] sm:$0xff]  ;;  %s253_s24 = smov [#allocation7]  }
  0x1d   :  { %167 = vmatprep.subr.mxu0 %v48_v0  ;;  %v43_v2 = vld [vmem:[#allocation2] sm:$0xff]  ;;  %v46_v3 = vld [vmem:[#allocation5 + $0x8] sm:$0xff]  ;;  %v45_v4 = vld [vmem:[#allocation5] sm:$0xff]  ;;  %s145_s25 = sshll.u32 %s253_s24, 4  ;;  %s146_s25 = int_to_ptr.vmem [resolvable:$true] %s145_s25 }
  0x1e   :  { %168 = vmatpush3.msra.mxu0 %v48_v0  ;;  %175 = vmatprep.mubr.msk.f32.mxu0 %vm56_vm0, %v43_v2  ;;  %v44_v5 = vld [vmem:[#allocation2 + $0x8] sm:$0xff]  ;;  %v158_v6 = vld [vmem:[%s301_s2] ss:$0 sm:$0xff]  ;;  %s223_s26 = scalar_lea.vmem %s146_s25, 256  ;;  %p228_p11 = scmp.lt.s32.totalorder %s146_s25, %s146_s25 }
  0x1f   :  { %169 = vmatprep.subr.mxu0 %v47_v1  ;;  %p224_p10 = scmp.ne.s32.totalorder %s146_s25, %s223_s26  ;;  %p229_p12 = scmp.lt.s32.totalorder %s223_s26, %s223_s26 }
  0x20   :  { %170 = vmatpush3.msra.mxu0 %v47_v1 }
  0x21   :  { %171 = vmatprep.subr.mxu0 %v46_v3  ;;  %p230_p13 = por %p229_p12, %p228_p11 }
  0x22   :  { %172 = vmatpush3.msra.mxu0 %v46_v3 }
  0x23   :  { %173 = vmatprep.subr.mxu0 %v45_v4  ;;  %p231_p0 = pnand %p230_p13, %p224_p10 }
  0x24   :  { %174 = vmatpush3.msra.mxu0 %v45_v4 }
  0x25   :  { %176 = vmatmul.mubr.msk.f32.vlgmr.msra.gmra.mxu0 %vm56_vm0, %v44_v5 }
  0xe5   :  { %v177_v7 = vpop.f32.mrf.mxu0 }
  0xe6   :  { %v135_v8 = vadd.f32 %v177_v7, %v158_v6 }
  0xe7   :  { %v129_v9 = vpop.f32.mrf.mxu0 }
  0xe8   :  { %139 = vst.msk [vmem:[#allocation7 + $0x8] sm:$0xff] %vm56_vm0, %v135_v8  ;;  %v130_v10 = vadd.f32 %v158_v6, %v129_v9 }
  0xea   :  { %138 = vst.msk [vmem:[#allocation7] sm:$0xff] %vm56_vm0, %v130_v10 }
  0xeb   :  { %234 = shalt.err (!%p231_p0)
}
  0xec   :  { %151 = dma.vmem_to_hbm [thread:$0]  %s146_s25, 256, %s302_s3, [#allocation4], %s250_s15, %s250_s15, %s251_s16  }
  0xed   :  { %247 = dma.done.wait [#allocation4], 256  }
  0xee   :  { %248 = vsyncadd [#allocation4], 4294967040 }
  0xef   :  { %155 = vsyncpa [#allocation3], 1 }
  0xf0   :  { %156 = vsyncpa [#allocation6], 1 }
  0xf1   :  { %157 = vsyncpa [#allocation4], 1 }

// kernel: tpu_custom_call.1
= control target key start
LH: loop header
LB: loop body
LE: loop exit
PB: predicated region body
PF: predicated region fallthrough
CT: control target
= control target key end

     0   :  { %8 = vsyncpa [#allocation3], 0  ;;  %s299_s0 = inlined_call_operand.hbm [shape: f32[16,32], index: 0, kind: input, shape index: {}]   ;;  %s300_s1 = inlined_call_operand.hbm [shape: f32[32,32], index: 1, kind: input, shape index: {}]   ;;  %s301_s2 = inlined_call_operand.vmem [shape: f32[1,32], index: 2, kind: input, shape index: {}]   ;;  %s302_s3 = inlined_call_operand.hbm [shape: f32[16,32], index: 3, kind: output, shape index: {}]  }
   0x1   :  { %9 = vsyncpa [#allocation6], 0 }
   0x2   :  { %10 = vsyncpa [#allocation4], 0  ;;  %s249_s12 = smov [#allocation2]  }
   0x3   :  { %s16_s13 = sshll.u32 %s249_s12, 4  ;;  %s17_s13 = int_to_ptr.vmem [resolvable:$true] %s16_s13 }
   0x4   :  { %s191_s14 = scalar_lea.vmem %s17_s13, 256  ;;  %p196_p1 = scmp.lt.s32.totalorder %s17_s13, %s17_s13 }
   0x5   :  { %p192_p0 = scmp.ne.s32.totalorder %s17_s13, %s191_s14  ;;  %p197_p2 = scmp.lt.s32.totalorder %s191_s14, %s191_s14 }
   0x7   :  { %p198_p3 = por %p197_p2, %p196_p1 }
   0x9   :  { %p199_p4 = pnand %p198_p3, %p192_p0 }
   0xb   :  { %202 = shalt.err (!%p199_p4)
}
   0xc   :  { %s250_s15 = smov 128   ;;  %s251_s16 = smov 8  }
   0xd   :  { %22 = dma.hbm_to_vmem [thread:$0]  %s299_s0, 256, %s17_s13, [#allocation3], %s250_s15, %s250_s15, %s251_s16  }
   0xe   :  { %s252_s19 = smov [#allocation5]  }
   0xf   :  { %s28_s20 = sshll.u32 %s252_s19, 4  ;;  %s29_s20 = int_to_ptr.vmem [resolvable:$true] %s28_s20 }
  0x10   :  { %s211_s21 = scalar_lea.vmem %s29_s20, 512  ;;  %p216_p6 = scmp.lt.s32.totalorder %s29_s20, %s29_s20 }
  0x11   :  { %p212_p5 = scmp.ne.s32.totalorder %s29_s20, %s211_s21  ;;  %p217_p7 = scmp.lt.s32.totalorder %s211_s21, %s211_s21 }
  0x13   :  { %p218_p8 = por %p217_p7, %p216_p6 }
  0x15   :  { %p219_p9 = pnand %p218_p8, %p212_p5 }
  0x17   :  { %222 = shalt.err (!%p219_p9)
}
  0x18   :  { %34 = dma.hbm_to_vmem [thread:$0]  %s300_s1, 512, %s29_s20, [#allocation6], %s250_s15, %s250_s15, %s251_s16  }
  0x19   :  { %243 = dma.done.wait [#allocation3], 256  }
  0x1a   :  { %244 = vsyncadd [#allocation3], 4294967040 }
  0x1b   :  { %245 = dma.done.wait [#allocation6], 512  }
  0x1c   :  { %246 = vsyncadd [#allocation6], 4294966784  ;;  %vm56_vm0 = vcmask 261120   ;;  %v48_v0 = vld [vmem:[#allocation5 + $0x18] sm:$0xff]  ;;  %v47_v1 = vld [vmem:[#allocation5 + $0x10] sm:$0xff]  ;;  %s253_s24 = smov [#allocation7]  }
  0x1d   :  { %167 = vmatprep.subr.mxu0 %v48_v0  ;;  %v43_v2 = vld [vmem:[#allocation2] sm:$0xff]  ;;  %v46_v3 = vld [vmem:[#allocation5 + $0x8] sm:$0xff]  ;;  %v45_v4 = vld [vmem:[#allocation5] sm:$0xff]  ;;  %s145_s25 = sshll.u32 %s253_s24, 4  ;;  %s146_s25 = int_to_ptr.vmem [resolvable:$true] %s145_s25 }
  0x1e   :  { %168 = vmatpush3.msra.mxu0 %v48_v0  ;;  %175 = vmatprep.mubr.msk.f32.mxu0 %vm56_vm0, %v43_v2  ;;  %v44_v5 = vld [vmem:[#allocation2 + $0x8] sm:$0xff]  ;;  %v158_v6 = vld [vmem:[%s301_s2] ss:$0 sm:$0xff]  ;;  %s223_s26 = scalar_lea.vmem %s146_s25, 256  ;;  %p228_p11 = scmp.lt.s32.totalorder %s146_s25, %s146_s25 }
  0x1f   :  { %169 = vmatprep.subr.mxu0 %v47_v1  ;;  %p224_p10 = scmp.ne.s32.totalorder %s146_s25, %s223_s26  ;;  %p229_p12 = scmp.lt.s32.totalorder %s223_s26, %s223_s26 }
  0x20   :  { %170 = vmatpush3.msra.mxu0 %v47_v1 }
  0x21   :  { %171 = vmatprep.subr.mxu0 %v46_v3  ;;  %p230_p13 = por %p229_p12, %p228_p11 }
  0x22   :  { %172 = vmatpush3.msra.mxu0 %v46_v3 }
  0x23   :  { %173 = vmatprep.subr.mxu0 %v45_v4  ;;  %p231_p0 = pnand %p230_p13, %p224_p10 }
  0x24   :  { %174 = vmatpush3.msra.mxu0 %v45_v4 }
  0x25   :  { %176 = vmatmul.mubr.msk.f32.vlgmr.msra.gmra.mxu0 %vm56_vm0, %v44_v5 }
  0xe5   :  { %v177_v7 = vpop.f32.mrf.mxu0 }
  0xe6   :  { %v135_v8 = vadd.f32 %v177_v7, %v158_v6 }
  0xe7   :  { %v129_v9 = vpop.f32.mrf.mxu0 }
  0xe8   :  { %139 = vst.msk [vmem:[#allocation7 + $0x8] sm:$0xff] %vm56_vm0, %v135_v8  ;;  %v130_v10 = vadd.f32 %v158_v6, %v129_v9 }
  0xea   :  { %138 = vst.msk [vmem:[#allocation7] sm:$0xff] %vm56_vm0, %v130_v10 }
  0xeb   :  { %234 = shalt.err (!%p231_p0)
}
  0xec   :  { %151 = dma.vmem_to_hbm [thread:$0]  %s146_s25, 256, %s302_s3, [#allocation4], %s250_s15, %s250_s15, %s251_s16  }
  0xed   :  { %247 = dma.done.wait [#allocation4], 256  }
  0xee   :  { %248 = vsyncadd [#allocation4], 4294967040 }
  0xef   :  { %155 = vsyncpa [#allocation3], 1 }
  0xf0   :  { %156 = vsyncpa [#allocation6], 1 }
  0xf1   :  { %157 = vsyncpa [#allocation4], 1 }

</bundles_post_ra>
